<compile_context>
chip_gen: v5e
topology: v5e:2x2
jax: 0.10.0
libtpu: 0.0.40
codegen_flags: <defaults>
</compile_context>

<pallas_src>
import jax
import jax.numpy as jnp
import numpy as np
from jax.experimental import pallas as pl
from jax.experimental.pallas import tpu as pltpu


def _round_up(x, m):
    return ((x + m - 1) // m) * m


def _make_kernel(nb, C, W, HW, mxu_dtype):
    inv_hw = 1.0 / HW

    def kernel(x_ref, dww_ref, m_ref, pw_ref, pb_ref, o_ref):
        # x_ref  : (nb, C, HW)    images x channels, flattened H*W on the lane axis
        # dww_ref: (C, 9)         depthwise 3x3 weights, taps on the lane axis
        # m_ref  : (9, HW)        per-tap zero-padding masks (1.0 valid / 0.0 padded)
        # pw_ref : (Cout, C)      pointwise 1x1 weights
        # pb_ref : (Cout, 1)      pointwise bias
        # o_ref  : (nb, Cout, HW)
        w_all = dww_ref[...].astype(jnp.float32)           # (C, 9)
        m_all = m_ref[...].astype(jnp.float32)              # (9, HW)
        pw = pw_ref[...].astype(mxu_dtype)                  # (Cout, C)
        pb = pb_ref[...].astype(jnp.float32)                 # (Cout, 1)

        # Hoisted per-tap slices (JAX does not CSE these; keep them out of the loops).
        wks = [w_all[:, k:k + 1] for k in range(9)]           # (C, 1) each
        mks = [m_all[k:k + 1, :] for k in range(9)]            # (1, HW) each

        for b in range(nb):                                    # nb is compile-time static
            x = x_ref[b].astype(jnp.float32)                    # (C, HW)

            # --- depthwise 3x3 conv (stride 1, padding 1) via masked lane rotations.
            # pltpu.roll rides the XLU slot and co-issues with the VPU FMAs.
            acc = x * wks[4]                                    # center tap, no mask
            for k in range(9):
                if k == 4:
                    continue
                kh, kw = k // 3, k % 3
                dh, dw = kh - 1, kw - 1
                shift = (-(dh * W + dw)) % HW
                tap = pltpu.roll(x, shift=shift, axis=1)
                acc = acc + (tap * mks[k]) * wks[k]
            # depthwise bias omitted: a per-channel constant is exactly cancelled by
            # the InstanceNorm mean subtraction (dead work).

            # --- InstanceNorm2d (affine=False, eps=1e-5, biased var), two-pass stats.
            mean = jnp.sum(acc, axis=1, keepdims=True) * inv_hw          # (C, 1)
            centered = acc - mean
            var = jnp.sum(centered * centered, axis=1, keepdims=True) * inv_hw
            normed = centered * jax.lax.rsqrt(var + 1e-5)

            # --- pointwise 1x1 conv: one MXU dot per image, lane-dense store.
            out = jnp.dot(pw, normed.astype(mxu_dtype),
                          preferred_element_type=jnp.float32) + pb
            o_ref[b] = out.astype(o_ref.dtype)

    return kernel


def _vmem_footprint_bytes(nb, C, Cout, HW):
    """Estimated VMEM footprint of one grid step, incl. default double-buffering,
    lane/sublane padding and in-kernel f32 temporaries."""
    f32 = 4
    hw_p = _round_up(HW, 128)
    c_p = _round_up(C, 8)
    co_p = _round_up(Cout, 8)
    x_tiles = 2 * nb * c_p * hw_p * f32            # double-buffered input block
    o_tiles = 2 * nb * co_p * hw_p * f32           # double-buffered output block
    dww = 2 * c_p * 128 * f32                       # (C, 9) lane-padded
    masks = 2 * _round_up(9, 8) * hw_p * f32
    pw = 2 * co_p * 128 * f32
    pb = 2 * co_p * 128 * f32
    temps = (5 * c_p + co_p) * hw_p * f32           # x, tap, acc, centered, normed, out
    return x_tiles + o_tiles + dww + masks + pw + pb + temps


def _vmem_budget_bytes():
    """Generation-aware budget: ~3/4 of physical VMEM (v7x: 64 MiB, v5e/v6e: 128 MiB)."""
    cap = 64 * 1024 * 1024          # conservative fallback (fits every generation)
    try:
        cap = int(pltpu.get_tpu_info().vmem_capacity_bytes)
    except Exception:
        pass
    return (cap * 3) // 4


def _pick_batch_block(N, C, Cout, HW, budget_bytes):
    """Largest nb dividing N whose block fits the VMEM budget, while keeping at least
    2 grid steps whenever N >= 2 (v7x shards 'parallel' grid axes over its 2 TCs)."""
    best = 1
    for nb in range(1, N + 1):
        if N % nb:
            continue
        if N >= 2 and N // nb < 2:
            continue
        if _vmem_footprint_bytes(nb, C, Cout, HW) > budget_bytes:
            continue
        best = nb
    return best


def decomposed_conv2d(x, dw_w, dw_b, pw_w, pw_b):
    """x: (N, C, H, W) NCHW.  dw_w: (C,1,3,3), dw_b: (C,), pw_w: (Cout,C,1,1), pw_b: (Cout,)."""
    N, C, H, W = x.shape
    Cout = pw_w.shape[0]
    HW = H * W

    budget = _vmem_budget_bytes()
    nb = _pick_batch_block(N, C, Cout, HW, budget)
    grid = (N // nb,)
    footprint = _vmem_footprint_bytes(nb, C, Cout, HW)
    vmem_limit = int(min(budget, max(2 * footprint, 32 * 1024 * 1024)))

    # Contiguous reshape only (no transpose, no pad): zero extra HBM passes.
    x3 = x.reshape(N, C, HW)

    # Depthwise weights with taps on the lane axis (single padded tile, not 9).
    dww = dw_w.reshape(C, 9)
    del dw_b  # exactly cancelled by the InstanceNorm mean subtraction

    # Precompute the 9 zero-padding masks host-side (1.0 valid / 0.0 padded lane).
    p = np.arange(HW)
    hi, wi = p // W, p % W
    rows = []
    for kh in range(3):
        for kw in range(3):
            dh, dwd = kh - 1, kw - 1
            valid = np.ones(HW, dtype=bool)
            if dh < 0:
                valid &= hi >= -dh
            elif dh > 0:
                valid &= hi < H - dh
            if dwd < 0:
                valid &= wi >= -dwd
            elif dwd > 0:
                valid &= wi < W - dwd
            rows.append(valid)
    masks = jnp.asarray(np.stack(rows).astype(np.float32))       # (9, HW)

    pw = pw_w.reshape(Cout, C)
    pb = pw_b.reshape(Cout, 1)

    # bf16 MXU operands only when the model itself runs in bf16 (v6e/v7x native);
    # f32 inputs keep full f32 accuracy.
    mxu_dtype = jnp.bfloat16 if x.dtype == jnp.bfloat16 else jnp.float32

    flops_per_image = (2 * 9 + 6) * C * HW + (2 * C + 1) * Cout * HW
    cost = pl.CostEstimate(
        flops=int(N * flops_per_image),
        transcendentals=int(N * C),
        bytes_accessed=int(N * (C + Cout) * HW * x.dtype.itemsize
                           + 4 * (9 * C + 9 * HW + Cout * C + Cout)),
    )

    out3 = pl.pallas_call(
        _make_kernel(nb, C, W, HW, mxu_dtype),
        out_shape=jax.ShapeDtypeStruct((N, Cout, HW), x.dtype),
        grid=grid,
        in_specs=[
            pl.BlockSpec((nb, C, HW), lambda i: (i, 0, 0)),
            pl.BlockSpec((C, 9), lambda i: (0, 0)),
            pl.BlockSpec((9, HW), lambda i: (0, 0)),
            pl.BlockSpec((Cout, C), lambda i: (0, 0)),
            pl.BlockSpec((Cout, 1), lambda i: (0, 0)),
        ],
        out_specs=pl.BlockSpec((nb, Cout, HW), lambda i: (i, 0, 0)),
        compiler_params=pltpu.CompilerParams(
            dimension_semantics=("parallel",),
            vmem_limit_bytes=vmem_limit,
        ),
        cost_estimate=cost,
    )(x3, dww, masks, pw, pb)

    return out3.reshape(N, Cout, H, W)


def _reference(x, dw_w, dw_b, pw_w, pw_b):
    """Pure-JAX reference matching PyTorch DecomposedConv2d.forward."""
    C = x.shape[1]
    Cout = pw_w.shape[0]
    y = jax.lax.conv_general_dilated(
        x, dw_w, window_strides=(1, 1), padding=((1, 1), (1, 1)),
        dimension_numbers=("NCHW", "OIHW", "NCHW"), feature_group_count=C)
    y = y + dw_b[None, :, None, None]
    mean = jnp.mean(y, axis=(2, 3), keepdims=True)
    var = jnp.mean((y - mean) ** 2, axis=(2, 3), keepdims=True)
    y = (y - mean) / jnp.sqrt(var + 1e-5)
    z = jnp.einsum("oc,nchw->nohw", pw_w.reshape(Cout, C), y)
    z = z + pw_b[None, :, None, None]
    return z


if __name__ == "__main__":
    N, C, Cout, H, W = 2, 4, 8, 16, 16

    key = jax.random.PRNGKey(0)
    kx, k1, k2, k3, k4 = jax.random.split(key, 5)

    x = jax.random.normal(kx, (N, C, H, W), dtype=jnp.float32)
    dw_w = jax.random.normal(k1, (C, 1, 3, 3), dtype=jnp.float32) * 0.2     # depthwise weight
    dw_b = jax.random.normal(k2, (C,), dtype=jnp.float32) * 0.1             # depthwise bias
    pw_w = jax.random.normal(k3, (Cout, C, 1, 1), dtype=jnp.float32) * 0.2  # pointwise weight
    pw_b = jax.random.normal(k4, (Cout,), dtype=jnp.float32) * 0.1          # pointwise bias

    out = decomposed_conv2d(x, dw_w, dw_b, pw_w, pw_b)
    out = jax.block_until_ready(out)

    ref = _reference(x, dw_w, dw_b, pw_w, pw_b)
    assert out.shape == (N, Cout, H, W), out.shape
    err = float(jnp.max(jnp.abs(out - ref)))
    assert jnp.allclose(out, ref, rtol=1e-4, atol=1e-4), err

    print("KERNEL_OK")
</pallas_src>

<mosaic_0001>
module attributes {stable_mosaic.version = 11 : i64} {
  func.func @kernel(%arg0: i32, %arg1: memref<1x4x256xf32, #tpu.memory_space<vmem>>, %arg2: memref<4x9xf32, #tpu.memory_space<vmem>>, %arg3: memref<9x256xf32, #tpu.memory_space<vmem>>, %arg4: memref<8x4xf32, #tpu.memory_space<vmem>>, %arg5: memref<8x1xf32, #tpu.memory_space<vmem>>, %arg6: memref<1x8x256xf32, #tpu.memory_space<vmem>>) attributes {dimension_semantics = [#tpu.dimension_semantics<parallel>], iteration_bounds = array<i64: 2>, scalar_prefetch = 0 : i64, scratch_operands = 0 : i64, tpu.core_type = #tpu.core_type<tc>, window_params = [{transform_indices = @transform_0, window_bounds = array<i64: 1, 4, 256>}, {pipeline_mode = #tpu.pipeline_mode<synchronous>, transform_indices = @transform_1, window_bounds = array<i64: 4, 9>}, {pipeline_mode = #tpu.pipeline_mode<synchronous>, transform_indices = @transform_2, window_bounds = array<i64: 9, 256>}, {pipeline_mode = #tpu.pipeline_mode<synchronous>, transform_indices = @transform_3, window_bounds = array<i64: 8, 4>}, {pipeline_mode = #tpu.pipeline_mode<synchronous>, transform_indices = @transform_4, window_bounds = array<i64: 8, 1>}, {transform_indices = @transform_5, window_bounds = array<i64: 1, 8, 256>}]} {
    %c0 = arith.constant 0 : index
    %c0_0 = arith.constant 0 : index
    %0 = vector.load %arg2[%c0, %c0_0] : memref<4x9xf32, #tpu.memory_space<vmem>>, vector<4x9xf32>
    %c0_1 = arith.constant 0 : index
    %c0_2 = arith.constant 0 : index
    %1 = vector.load %arg3[%c0_1, %c0_2] : memref<9x256xf32, #tpu.memory_space<vmem>>, vector<9x256xf32>
    %c0_3 = arith.constant 0 : index
    %c0_4 = arith.constant 0 : index
    %2 = vector.load %arg4[%c0_3, %c0_4] : memref<8x4xf32, #tpu.memory_space<vmem>>, vector<8x4xf32>
    %c0_5 = arith.constant 0 : index
    %c0_6 = arith.constant 0 : index
    %3 = vector.load %arg5[%c0_5, %c0_6] : memref<8x1xf32, #tpu.memory_space<vmem>>, vector<8x1xf32>
    %4 = vector.extract_strided_slice %0 {offsets = [0, 0], sizes = [4, 1], strides = [1, 1]} : vector<4x9xf32> to vector<4x1xf32>
    %5 = vector.extract_strided_slice %0 {offsets = [0, 1], sizes = [4, 1], strides = [1, 1]} : vector<4x9xf32> to vector<4x1xf32>
    %6 = vector.extract_strided_slice %0 {offsets = [0, 2], sizes = [4, 1], strides = [1, 1]} : vector<4x9xf32> to vector<4x1xf32>
    %7 = vector.extract_strided_slice %0 {offsets = [0, 3], sizes = [4, 1], strides = [1, 1]} : vector<4x9xf32> to vector<4x1xf32>
    %8 = vector.extract_strided_slice %0 {offsets = [0, 4], sizes = [4, 1], strides = [1, 1]} : vector<4x9xf32> to vector<4x1xf32>
    %9 = vector.extract_strided_slice %0 {offsets = [0, 5], sizes = [4, 1], strides = [1, 1]} : vector<4x9xf32> to vector<4x1xf32>
    %10 = vector.extract_strided_slice %0 {offsets = [0, 6], sizes = [4, 1], strides = [1, 1]} : vector<4x9xf32> to vector<4x1xf32>
    %11 = vector.extract_strided_slice %0 {offsets = [0, 7], sizes = [4, 1], strides = [1, 1]} : vector<4x9xf32> to vector<4x1xf32>
    %12 = vector.extract_strided_slice %0 {offsets = [0, 8], sizes = [4, 1], strides = [1, 1]} : vector<4x9xf32> to vector<4x1xf32>
    %13 = vector.extract_strided_slice %1 {offsets = [0, 0], sizes = [1, 256], strides = [1, 1]} : vector<9x256xf32> to vector<1x256xf32>
    %14 = vector.extract_strided_slice %1 {offsets = [1, 0], sizes = [1, 256], strides = [1, 1]} : vector<9x256xf32> to vector<1x256xf32>
    %15 = vector.extract_strided_slice %1 {offsets = [2, 0], sizes = [1, 256], strides = [1, 1]} : vector<9x256xf32> to vector<1x256xf32>
    %16 = vector.extract_strided_slice %1 {offsets = [3, 0], sizes = [1, 256], strides = [1, 1]} : vector<9x256xf32> to vector<1x256xf32>
    %17 = vector.extract_strided_slice %1 {offsets = [5, 0], sizes = [1, 256], strides = [1, 1]} : vector<9x256xf32> to vector<1x256xf32>
    %18 = vector.extract_strided_slice %1 {offsets = [6, 0], sizes = [1, 256], strides = [1, 1]} : vector<9x256xf32> to vector<1x256xf32>
    %19 = vector.extract_strided_slice %1 {offsets = [7, 0], sizes = [1, 256], strides = [1, 1]} : vector<9x256xf32> to vector<1x256xf32>
    %20 = vector.extract_strided_slice %1 {offsets = [8, 0], sizes = [1, 256], strides = [1, 1]} : vector<9x256xf32> to vector<1x256xf32>
    %c0_7 = arith.constant 0 : index
    %c0_8 = arith.constant 0 : index
    %c0_9 = arith.constant 0 : index
    %21 = vector.load %arg1[%c0_7, %c0_8, %c0_9] : memref<1x4x256xf32, #tpu.memory_space<vmem>>, vector<1x4x256xf32>
    %22 = vector.shape_cast %21 : vector<1x4x256xf32> to vector<4x256xf32>
    %23 = vector.broadcast %8 : vector<4x1xf32> to vector<4x256xf32>
    %24 = arith.mulf %22, %23 : vector<4x256xf32>
    %c17_i32 = arith.constant 17 : i32
    %25 = tpu.dynamic_rotate %22 by %c17_i32 dim 1 : vector<4x256xf32>, i32 -> vector<4x256xf32>
    %26 = vector.broadcast %13 : vector<1x256xf32> to vector<4x256xf32>
    %27 = arith.mulf %25, %26 : vector<4x256xf32>
    %28 = vector.broadcast %4 : vector<4x1xf32> to vector<4x256xf32>
    %29 = arith.mulf %27, %28 : vector<4x256xf32>
    %30 = arith.addf %24, %29 : vector<4x256xf32>
    %c16_i32 = arith.constant 16 : i32
    %31 = tpu.dynamic_rotate %22 by %c16_i32 dim 1 : vector<4x256xf32>, i32 -> vector<4x256xf32>
    %32 = vector.broadcast %14 : vector<1x256xf32> to vector<4x256xf32>
    %33 = arith.mulf %31, %32 : vector<4x256xf32>
    %34 = vector.broadcast %5 : vector<4x1xf32> to vector<4x256xf32>
    %35 = arith.mulf %33, %34 : vector<4x256xf32>
    %36 = arith.addf %30, %35 : vector<4x256xf32>
    %c15_i32 = arith.constant 15 : i32
    %37 = tpu.dynamic_rotate %22 by %c15_i32 dim 1 : vector<4x256xf32>, i32 -> vector<4x256xf32>
    %38 = vector.broadcast %15 : vector<1x256xf32> to vector<4x256xf32>
    %39 = arith.mulf %37, %38 : vector<4x256xf32>
    %40 = vector.broadcast %6 : vector<4x1xf32> to vector<4x256xf32>
    %41 = arith.mulf %39, %40 : vector<4x256xf32>
    %42 = arith.addf %36, %41 : vector<4x256xf32>
    %c1_i32 = arith.constant 1 : i32
    %43 = tpu.dynamic_rotate %22 by %c1_i32 dim 1 : vector<4x256xf32>, i32 -> vector<4x256xf32>
    %44 = vector.broadcast %16 : vector<1x256xf32> to vector<4x256xf32>
    %45 = arith.mulf %43, %44 : vector<4x256xf32>
    %46 = vector.broadcast %7 : vector<4x1xf32> to vector<4x256xf32>
    %47 = arith.mulf %45, %46 : vector<4x256xf32>
    %48 = arith.addf %42, %47 : vector<4x256xf32>
    %c255_i32 = arith.constant 255 : i32
    %49 = tpu.dynamic_rotate %22 by %c255_i32 dim 1 : vector<4x256xf32>, i32 -> vector<4x256xf32>
    %50 = vector.broadcast %17 : vector<1x256xf32> to vector<4x256xf32>
    %51 = arith.mulf %49, %50 : vector<4x256xf32>
    %52 = vector.broadcast %9 : vector<4x1xf32> to vector<4x256xf32>
    %53 = arith.mulf %51, %52 : vector<4x256xf32>
    %54 = arith.addf %48, %53 : vector<4x256xf32>
    %c241_i32 = arith.constant 241 : i32
    %55 = tpu.dynamic_rotate %22 by %c241_i32 dim 1 : vector<4x256xf32>, i32 -> vector<4x256xf32>
    %56 = vector.broadcast %18 : vector<1x256xf32> to vector<4x256xf32>
    %57 = arith.mulf %55, %56 : vector<4x256xf32>
    %58 = vector.broadcast %10 : vector<4x1xf32> to vector<4x256xf32>
    %59 = arith.mulf %57, %58 : vector<4x256xf32>
    %60 = arith.addf %54, %59 : vector<4x256xf32>
    %c240_i32 = arith.constant 240 : i32
    %61 = tpu.dynamic_rotate %22 by %c240_i32 dim 1 : vector<4x256xf32>, i32 -> vector<4x256xf32>
    %62 = vector.broadcast %19 : vector<1x256xf32> to vector<4x256xf32>
    %63 = arith.mulf %61, %62 : vector<4x256xf32>
    %64 = vector.broadcast %11 : vector<4x1xf32> to vector<4x256xf32>
    %65 = arith.mulf %63, %64 : vector<4x256xf32>
    %66 = arith.addf %60, %65 : vector<4x256xf32>
    %c239_i32 = arith.constant 239 : i32
    %67 = tpu.dynamic_rotate %22 by %c239_i32 dim 1 : vector<4x256xf32>, i32 -> vector<4x256xf32>
    %68 = vector.broadcast %20 : vector<1x256xf32> to vector<4x256xf32>
    %69 = arith.mulf %67, %68 : vector<4x256xf32>
    %70 = vector.broadcast %12 : vector<4x1xf32> to vector<4x256xf32>
    %71 = arith.mulf %69, %70 : vector<4x256xf32>
    %72 = arith.addf %66, %71 : vector<4x256xf32>
    %cst = arith.constant dense<0.000000e+00> : vector<4xf32>
    %73 = vector.multi_reduction <add>, %72, %cst [1] : vector<4x256xf32> to vector<4xf32>
    %74 = vector.shape_cast %73 : vector<4xf32> to vector<4x1xf32>
    %cst_10 = arith.constant 3.906250e-03 : f32
    %75 = vector.broadcast %cst_10 : f32 to vector<4x1xf32>
    %76 = arith.mulf %74, %75 : vector<4x1xf32>
    %77 = vector.broadcast %76 : vector<4x1xf32> to vector<4x256xf32>
    %78 = arith.subf %72, %77 : vector<4x256xf32>
    %79 = arith.mulf %78, %78 : vector<4x256xf32>
    %cst_11 = arith.constant dense<0.000000e+00> : vector<4xf32>
    %80 = vector.multi_reduction <add>, %79, %cst_11 [1] : vector<4x256xf32> to vector<4xf32>
    %81 = vector.shape_cast %80 : vector<4xf32> to vector<4x1xf32>
    %cst_12 = arith.constant 3.906250e-03 : f32
    %82 = vector.broadcast %cst_12 : f32 to vector<4x1xf32>
    %83 = arith.mulf %81, %82 : vector<4x1xf32>
    %cst_13 = arith.constant 9.99999974E-6 : f32
    %84 = vector.broadcast %cst_13 : f32 to vector<4x1xf32>
    %85 = arith.addf %83, %84 : vector<4x1xf32>
    %86 = math.rsqrt %85 : vector<4x1xf32>
    %87 = vector.broadcast %86 : vector<4x1xf32> to vector<4x256xf32>
    %88 = arith.mulf %78, %87 : vector<4x256xf32>
    %cst_14 = arith.constant dense<0.000000e+00> : vector<8x256xf32>
    %89 = tpu.matmul %2, %88, %cst_14 {dimension_numbers = #tpu.dot_dimension_numbers<[1], [0], [0], [1], [0, 0, 1, 1], [], []>} : vector<8x4xf32>, vector<4x256xf32>, vector<8x256xf32> -> vector<8x256xf32>
    %90 = vector.broadcast %3 : vector<8x1xf32> to vector<8x256xf32>
    %91 = arith.addf %89, %90 : vector<8x256xf32>
    %c0_15 = arith.constant 0 : index
    %c0_16 = arith.constant 0 : index
    %c0_17 = arith.constant 0 : index
    %92 = vector.load %arg6[%c0_15, %c0_16, %c0_17] : memref<1x8x256xf32, #tpu.memory_space<vmem>>, vector<1x8x256xf32>
    %93 = vector.shape_cast %92 : vector<1x8x256xf32> to vector<8x256xf32>
    %94 = vector.shape_cast %91 : vector<8x256xf32> to vector<1x8x256xf32>
    tpu.vector_store %arg6[%c0_15, %c0_16, %c0_17], %94 {strides = array<i32>} : memref<1x8x256xf32, #tpu.memory_space<vmem>>, vector<1x8x256xf32>,
    return
  }
  func.func @transform_0(%arg0: i32) -> (i32, i32, i32) {
    %c0_i32 = arith.constant 0 : i32
    %c0_i32_0 = arith.constant 0 : i32
    %c0_i32_1 = arith.constant 0 : i32
    return %arg0, %c0_i32, %c0_i32_0 : i32, i32, i32
  }
  func.func @transform_1(%arg0: i32) -> (i32, i32) {
    %c0_i32 = arith.constant 0 : i32
    %c0_i32_0 = arith.constant 0 : i32
    %c0_i32_1 = arith.constant 0 : i32
    return %c0_i32, %c0_i32_0 : i32, i32
  }
  func.func @transform_2(%arg0: i32) -> (i32, i32) {
    %c0_i32 = arith.constant 0 : i32
    %c0_i32_0 = arith.constant 0 : i32
    %c0_i32_1 = arith.constant 0 : i32
    return %c0_i32, %c0_i32_0 : i32, i32
  }
  func.func @transform_3(%arg0: i32) -> (i32, i32) {
    %c0_i32 = arith.constant 0 : i32
    %c0_i32_0 = arith.constant 0 : i32
    %c0_i32_1 = arith.constant 0 : i32
    return %c0_i32, %c0_i32_0 : i32, i32
  }
  func.func @transform_4(%arg0: i32) -> (i32, i32) {
    %c0_i32 = arith.constant 0 : i32
    %c0_i32_0 = arith.constant 0 : i32
    %c0_i32_1 = arith.constant 0 : i32
    return %c0_i32, %c0_i32_0 : i32, i32
  }
  func.func @transform_5(%arg0: i32) -> (i32, i32, i32) {
    %c0_i32 = arith.constant 0 : i32
    %c0_i32_0 = arith.constant 0 : i32
    %c0_i32_1 = arith.constant 0 : i32
    return %arg0, %c0_i32, %c0_i32_0 : i32, i32, i32
  }
}

</mosaic_0001>

<bundles_post_ra>
// kernel: tpu_custom_call.1
= control target key start
LH: loop header
LB: loop body
LE: loop exit
PB: predicated region body
PF: predicated region fallthrough
CT: control target
= control target key end

     0   :  { %10 = vsyncpa [#allocation3], 0  ;;  %s1174_s0 = inlined_call_operand.vmem [shape: f32[2,4,256], index: 0, kind: input, shape index: {}]   ;;  %s1175_s1 = inlined_call_operand.vmem [shape: f32[4,9], index: 1, kind: input, shape index: {}]   ;;  %s1176_s2 = inlined_call_operand.hbm [shape: f32[9,256], index: 2, kind: input, shape index: {}]   ;;  %s1177_s3 = inlined_call_operand.vmem [shape: f32[8,4], index: 3, kind: input, shape index: {}]   ;;  %s1178_s4 = inlined_call_operand.vmem [shape: f32[8,1], index: 4, kind: input, shape index: {}]   ;;  %s1179_s5 = inlined_call_operand.hbm [shape: f32[2,8,256], index: 5, kind: output, shape index: {}]  }
   0x1   :  { %11 = vsyncpa [#allocation4], 0 }
   0x2   :  { %13 = vsyncpa [#allocation4 + $0x1], 0  ;;  %s936_s18 = smov 0   ;;  %s938_s19 = smov 0  }
   0x3   :  { %s940_s20 = smov 0   ;;  %s942_s21 = smov 0  }
   0x4 LB: > { %s957_s22 = sadd.s32 4294967295, %s883_s21   ;;  %s683_s23 = sadd.s32 4294967294, %s883_s21   ;;  %s883_s21 = sphi %s942_s21, %s1185_s21   ;;  %s879_s20 = sphi %s940_s20, %s1184_s20   ;;  %s875_s19 = sphi %s938_s19, %s1183_s19   ;;  %s871_s18 = sphi %s936_s18, %s1182_s18  }
   0x5   : > { %s961_s24 = sadd.s32 1, %s883_s21   ;;  %s136_s25 = sadd.s32 1, %s879_s20 }
   0x6   : > { %s133_s26 = ssub.s32 %s883_s21, %s961_s24  ;;  %p146_p0 = scmp.ne.s32.totalorder %s879_s20, %s875_s19 }
   0x7   : > { %p134_p1 = scmp.eq.s32.totalorder %s133_s26, 0  ;;  %p147_p2 = scmp.eq.s32.totalorder %s957_s22, 1 }
   0x8   : > { %p152_p3 = scmp.ne.s32.totalorder %s875_s19, %s871_s18  ;;  %p153_p4 = scmp.eq.s32.totalorder %s683_s23, 1 }
   0x9   : > { %s972_s27 = scalar_select %p134_p1, %s879_s20, %s136_s25  }
   0xa   : > { %p974_p5 = por %p147_p2, %p146_p0  ;;  %p978_p6 = por %p153_p4, %p152_p3 }
   0xb   : > { %p684_p7 = scmp.ge.s32.totalorder %s883_s21, 1  ;;  %p160_p8 = scmp.lt.s32.totalorder %s883_s21, 3 }
   0xc   : > { %p717_p9 = scmp.eq.s32.totalorder %s957_s22, 0  ;;  %s174_s7 = sshll.u32 %s1176_s2, 4  ;;  %s175_s7 = int_to_ptr.hbm [resolvable:$true] %s174_s7 }
   0xd   : > { %p161_p10 = pnand %p684_p7, %p160_p8  ;;  %s885_s8 = smov [#allocation2]  }
   0xe   : > { %s176_s9 = sshll.u32 %s885_s8, 4  ;;  %s886_s10 = smov 256   ;;  %s177_s9 = int_to_ptr.vmem [resolvable:$true] %s176_s9 }
   0xf   : > { %p709_p11 = pneg %p161_p10  ;;  %s887_s11 = smov 16  }
  0x10   : > { %206 = sbr.rel (%p161_p10) target bundleno = 655 (0x28f), region = 40 }
  0x11   : > { %p710_p12 = pnand %p717_p9, %p709_p11 }
  0x13   : > { %712 = dma.hbm_to_vmem [thread:$0]  (!%p710_p12), %s175_s7, 512, %s177_s9, [#allocation3], %s886_s10, %s886_s10, %s887_s11  }
  0x15   : > { %862 = dma.done.wait (%p717_p9), [#allocation3], 512  }
  0x16   : > { %864 = vsyncadd (%p717_p9), [#allocation3], 4294966784  ;;  %p235_p13 = scmp.lt.s32.totalorder %s957_s22, 1  ;;  %v888_v0 = vmov 0   ;;  %v1005_v2 = vld [vmem:[%s1175_s1] sm:$0xf]  ;;  %v268_v39 = vlaneseq }
  0x17   : > { %773 = vset.pattern.permute.xlu2 %v888_v0  ;;  %s889_s25 = smov 17   ;;  %v890_v5 = vmov 4   ;;  %s891_s26 = smov 16   ;;  %v892_v8 = vmov 1   ;;  %v894_v11 = vmov 2   ;;  %v896_v14 = vmov 3  }
  0x18   : > { %s236_s12 = scalar_select %p235_p13, %s957_s22, 1  ;;  %278 = vperm.xlu2 %773, %v1005_v2   ;;  %v898_v17 = vmov 8   ;;  %v899_v18 = vmov 5   ;;  %v901_v21 = vmov 6   ;;  %v903_v24 = vmov 7   ;;  %v1039_v43 = vld [vmem:[#allocation2 + $0x8] sm:$0xff] }
  0x19   : > { %s893_s30 = smov 15   ;;  %s895_s6 = smov 1   ;;  %781 = vset.pattern.permute.xlu0 %v898_v17  ;;  %v1037_v42 = vand.u32 127, %v268_v39  ;;  %v274_v45 = vperm.slane %v1039_v43, 0  ;;  %v303_v47 = vperm.slane %v1039_v43, 1  ;;  %v1054_v53 = vld [vmem:[#allocation2] sm:$0xff] }
  0x1a   : > { %s701_s13 = sshll.u32 %s236_s12, 3  ;;  %s897_s7 = smov 127   ;;  %v905_v50 = vmov 839922192   ;;  %v331_v55 = vperm.slane %v1039_v43, 2  ;;  %v273_v58 = vperm.slane %v1054_v53, 0 }
  0x1b   : > { %s239_s16 = scalar_lea.vmem %s1174_s0, %s701_s13  ;;  %s900_s8 = smov 113   ;;  %vm270_vm0 = vcmp.lt.s32.totalorder %v1037_v42, 17  ;;  %vm299_vm1 = vcmp.lt.s32.totalorder %v1037_v42, 16  ;;  %v253_v51 = vunpack.c.l.s4 %v905_v50  ;;  %vm327_vm2 = vcmp.lt.s32.totalorder %v1037_v42, 15 }
  0x1c   : > { %v1000_v1 = vld [vmem:[%s239_s16] sm:$0xff]  ;;  %s902_s9 = smov 112   ;;  %s904_s10 = smov 111   ;;  %vm355_vm3 = vcmp.lt.s32.totalorder %v1037_v42, 1  ;;  %v302_v60 = vperm.slane %v1054_v53, 1  ;;  %v359_v63 = vperm.slane %v1039_v43, 3 }
  0x1d   : > { %259 = vst [vmem:[#allocation1] ss:$2 sm:$0xff] %v1000_v1  ;;  %v1061_v59 = vunpack.c.0.s8 %v253_v51  ;;  %vm383_vm4 = vcmp.lt.s32.totalorder %v1037_v42, 127  ;;  %vm411_vm5 = vcmp.lt.s32.totalorder %v1037_v42, 113  ;;  %vm286_vm6 = vcmask 1043456   ;;  %s232_s15 = sand.u32 1, %s875_s19  }
  0x1e   : > { %vm439_vm7 = vcmp.lt.s32.totalorder %v1037_v42, 112  ;;  %vm467_vm8 = vcmp.lt.s32.totalorder %v1037_v42, 111  ;;  %vm545_vm12 = vcmask 31744   ;;  %s689_s16 = sshll.u32 %s232_s15, 4  ;;  %s702_s17 = sshll.u32 %s957_s22, 4 }
  0x1f   : > { %s837_s12 = scalar_lea.hbm %s1179_s5, 32 }
  0x20   : > { %774 = vset.pattern.permute.xlu2 %v890_v5 }
  0x21   : > { %250 = vperm.xlu2 %774, %v1005_v2  }
  0x24   : > { %v260_v3 = vld.sshfl [vmem:[#allocation1] sm:$0xff pattern:$0x75316420]  ;;  %v261_v4 = vld.sshfl [vmem:[#allocation1 + $0x8] sm:$0xff pattern:$0x75316420] }
  0x25   : > { %264 = vrot.lane.b32.xlu0 %v260_v3, %s889_s25  ;;  %290 = vst [vmem:[#allocation1] ss:$2 sm:$0xff] %v1000_v1 }
  0x29   : > { %775 = vset.pattern.permute.xlu2 %v892_v8 }
  0x2a   : > { %307 = vperm.xlu2 %775, %v1005_v2  }
  0x2c   : > { %v291_v6 = vld.sshfl [vmem:[#allocation1] sm:$0xff pattern:$0x75316420]  ;;  %v292_v7 = vld.sshfl [vmem:[#allocation1 + $0x8] sm:$0xff pattern:$0x75316420] }
  0x2d   : > { %266 = vrot.lane.b32.xlu0 %v261_v4, %s889_s25  ;;  %295 = vrot.lane.b32.xlu1 %v291_v6, %s891_s26  ;;  %318 = vst [vmem:[#allocation1] ss:$2 sm:$0xff] %v1000_v1  ;;  %v387_v6 = vperm.slane %v1039_v43, 5 }
  0x32   : > { %776 = vset.pattern.permute.xlu2 %v894_v11  ;;  %v330_v11 = vperm.slane %v1054_v53, 2 }
  0x33   : > { %335 = vperm.xlu2 %776, %v1005_v2  }
  0x34   : > { %v319_v9 = vld.sshfl [vmem:[#allocation1] sm:$0xff pattern:$0x75316420]  ;;  %v320_v10 = vld.sshfl [vmem:[#allocation1 + $0x8] sm:$0xff pattern:$0x75316420] }
  0x35   : > { %297 = vrot.lane.b32.xlu1 %v292_v7, %s891_s26  ;;  %323 = vrot.lane.b32.xlu0 %v319_v9, %s893_s30  ;;  %346 = vst [vmem:[#allocation1] ss:$2 sm:$0xff] %v1000_v1  ;;  %s607_s26 = scalar_lea.hbm %s1179_s5, %s702_s17 }
  0x3b   : > { %777 = vset.pattern.permute.xlu2 %v896_v14 }
  0x3c   : > { %v347_v12 = vld.sshfl [vmem:[#allocation1] sm:$0xff pattern:$0x75316420]  ;;  %v348_v13 = vld.sshfl [vmem:[#allocation1 + $0x8] sm:$0xff pattern:$0x75316420]  ;;  %363 = vperm.xlu2 %777, %v1005_v2  }
  0x3d   : > { %325 = vrot.lane.b32.xlu1 %v320_v10, %s893_s30  ;;  %351 = vrot.lane.b32.xlu0 %v347_v12, %s895_s6  ;;  %374 = vst [vmem:[#allocation1] ss:$2 sm:$0xff] %v1000_v1  ;;  %s234_s30 = scalar_lea.vmem [#allocation5], %s689_s16 }
  0x44   : > { %v375_v15 = vld.sshfl [vmem:[#allocation1] sm:$0xff pattern:$0x75316420]  ;;  %v376_v16 = vld.sshfl [vmem:[#allocation1 + $0x8] sm:$0xff pattern:$0x75316420]  ;;  %778 = vset.pattern.permute.xlu2 %v899_v18 }
  0x45   : > { %353 = vrot.lane.b32.xlu1 %v348_v13, %s895_s6  ;;  %379 = vrot.lane.b32.xlu0 %v375_v15, %s897_s7  ;;  %402 = vst [vmem:[#allocation1] ss:$2 sm:$0xff] %v1000_v1  ;;  %s609_s6 = sshll.u32 %s234_s30, 4  ;;  %s610_s6 = int_to_ptr.vmem [resolvable:$true] %s609_s6 }
  0x46   : > { %391 = vperm.xlu2 %778, %v1005_v2  }
  0x4c   : > { %v403_v19 = vld.sshfl [vmem:[#allocation1] sm:$0xff pattern:$0x75316420]  ;;  %v404_v20 = vld.sshfl [vmem:[#allocation1 + $0x8] sm:$0xff pattern:$0x75316420] }
  0x4d   : > { %381 = vrot.lane.b32.xlu1 %v376_v16, %s897_s7  ;;  %407 = vrot.lane.b32.xlu0 %v403_v19, %s900_s8  ;;  %430 = vst [vmem:[#allocation1] ss:$2 sm:$0xff] %v1000_v1  ;;  %v415_v16 = vperm.slane %v1039_v43, 6  ;;  %s611_s7 = sshll.u32 %s607_s26, 4  ;;  %s612_s7 = int_to_ptr.hbm [resolvable:$true] %s611_s7 }
  0x4e   : > { %779 = vset.pattern.permute.xlu2 %v901_v21  ;;  %v358_v21 = vperm.slane %v1054_v53, 3 }
  0x4f   : > { %419 = vperm.xlu2 %779, %v1005_v2  }
  0x54   : > { %v431_v22 = vld.sshfl [vmem:[#allocation1] sm:$0xff pattern:$0x75316420]  ;;  %v432_v23 = vld.sshfl [vmem:[#allocation1 + $0x8] sm:$0xff pattern:$0x75316420] }
  0x55   : > { %409 = vrot.lane.b32.xlu1 %v404_v20, %s900_s8  ;;  %435 = vrot.lane.b32.xlu0 %v431_v22, %s902_s9  ;;  %458 = vst [vmem:[#allocation1] ss:$2 sm:$0xff] %v1000_v1  ;;  %v386_v22 = vperm.slane %v1054_v53, 5  ;;  %s596_s8 = scalar_lea.sflag [#allocation4], %s232_s15 }
  0x57   : > { %780 = vset.pattern.permute.xlu2 %v903_v24 }
  0x58   : > { %447 = vperm.xlu2 %780, %v1005_v2  }
  0x5c   : > { %v459_v25 = vld.sshfl [vmem:[#allocation1] sm:$0xff pattern:$0x75316420]  ;;  %v460_v26 = vld.sshfl [vmem:[#allocation1 + $0x8] sm:$0xff pattern:$0x75316420] }
  0x5d   : > { %437 = vrot.lane.b32.xlu1 %v432_v23, %s902_s9  ;;  %463 = vrot.lane.b32.xlu0 %v459_v25, %s904_s10  ;;  %s831_s9 = sshra.s32 %s612_s7, 4  ;;  %s832_s9 = int_to_ptr.hbm [resolvable:$true] %s831_s9 }
  0x5e   : > { %s833_s22 = scalar_lea.hbm %s832_s9, 16  ;;  %p838_p3 = scmp.lt.s32.totalorder %s832_s9, %s1179_s5 }
  0x5f   : > { %p834_p0 = scmp.ne.s32.totalorder %s832_s9, %s833_s22  ;;  %p839_p4 = scmp.lt.s32.totalorder %s837_s12, %s833_s22 }
  0x61   : > { %p835_p1 = pnand %p834_p0, %p974_p5  ;;  %p840_p7 = por %p839_p4, %p838_p3 }
  0x63   : > { %p836_p2 = pneg %p835_p1 }
  0x65   : > { %465 = vrot.lane.b32.xlu1 %v460_v26, %s904_s10  ;;  %475 = vperm.xlu0 %781, %v1005_v2   ;;  %p841_p8 = pnand %p840_p7, %p836_p2 }
  0x6d   : > { %782 = vset.pattern.permute.xlu0 %v888_v0 }
  0x72   : > { %v1025_v27 = vpop.permute.xlu2 %278 }
  0x7b   : > { %v1027_v28 = vpop.permute.xlu2 %250 }
  0x7c   : > { %v255_v13 = vperm.slane %v1027_v28, %v1061_v59 }
  0x84   : > { %v1029_v30 = vpop.permute.xlu2 %307 }
  0x8d   : > { %v1031_v35 = vpop.permute.xlu2 %335 }
  0x96   : > { %v1033_v38 = vpop.permute.xlu2 %363 }
  0x97   : > { %v265_v29 = vpop.permute.xlu0 %264 }
  0x9f   : > { %v267_v31 = vpop.permute.xlu0 %266  ;;  %v296_v32 = vpop.permute.xlu1 %295 }
  0xa0   : > { %v1042_v44 = vpop.permute.xlu2 %391  ;;  %v271_v46 = vsel %vm270_vm0, %v265_v29, %v267_v31  ;;  %v272_v61 = vsel %vm270_vm0, %v267_v31, %v265_v29 }
  0xa1   : > { %v276_v54 = vmul.f32 %v274_v45, %v271_v46  ;;  %v275_v9 = vmul.f32 %v273_v58, %v272_v61 }
  0xa3   : > { %v282_v0 = vmul.f32 %v1025_v27, %v276_v54  ;;  %v281_v24 = vmul.f32 %v1025_v27, %v275_v9 }
  0xa5   : > { %v285_v17 = vrot.slane %v282_v0, 4 }
  0xa7   : > { %v298_v33 = vpop.permute.xlu1 %297  ;;  %v324_v34 = vpop.permute.xlu0 %323 }
  0xa8   : > { %v300_v52 = vsel %vm299_vm1, %v296_v32, %v298_v33  ;;  %v301_v62 = vsel %vm299_vm1, %v298_v33, %v296_v32  ;;  %v443_v32 = vperm.slane %v1039_v43, 7  ;;  %v287_v33 = vsel %vm286_vm6, %v281_v24, %v285_v17 }
  0xa9   : > { %v305_v56 = vmul.f32 %v303_v47, %v300_v52  ;;  %v1073_v4 = vpop.permute.xlu2 %419  ;;  %v304_v10 = vmul.f32 %v302_v60, %v301_v62 }
  0xab   : > { %v311_v5 = vmul.f32 %v1029_v30, %v305_v56  ;;  %v310_v25 = vmul.f32 %v1029_v30, %v304_v10 }
  0xad   : > { %v314_v20 = vrot.slane %v311_v5, 4 }
  0xaf   : > { %v326_v36 = vpop.permute.xlu1 %325  ;;  %v352_v37 = vpop.permute.xlu0 %351  ;;  %v315_v30 = vsel %vm286_vm6, %v310_v25, %v314_v20 }
  0xb0   : > { %v328_v57 = vsel %vm327_vm2, %v324_v34, %v326_v36  ;;  %v329_v14 = vsel %vm327_vm2, %v326_v36, %v324_v34  ;;  %v257_v34 = vmul.f32 %v255_v13, %v1000_v1 }
  0xb1   : > { %v333_v2 = vmul.f32 %v331_v55, %v328_v57  ;;  %v332_v26 = vmul.f32 %v330_v11, %v329_v14 }
  0xb2   : > { %v289_v55 = vadd.f32 %v287_v33, %v257_v34 }
  0xb3   : > { %v339_v18 = vmul.f32 %v1031_v35, %v333_v2  ;;  %v338_v43 = vmul.f32 %v1031_v35, %v332_v26  ;;  %v783_v2 = vld [vmem:[#allocation2 + $0x10] ss:$0 sm:$0xff] }
  0xb4   : > { %v317_v61 = vadd.f32 %v315_v30, %v289_v55 }
  0xb5   : > { %v342_v36 = vrot.slane %v339_v18, 4 }
  0xb7   : > { %v354_v40 = vpop.permute.xlu1 %353  ;;  %v1035_v41 = vpop.permute.xlu0 %379  ;;  %v343_v56 = vsel %vm286_vm6, %v338_v43, %v342_v36  ;;  %v246_v43 = vld [vmem:[%s1178_s4] sm:$0xff] }
  0xb8   : > { %v356_v3 = vsel %vm355_vm3, %v352_v37, %v354_v40  ;;  %v357_v28 = vsel %vm355_vm3, %v354_v40, %v352_v37  ;;  %v414_v40 = vperm.slane %v1054_v53, 6  ;;  %v345_v5 = vadd.f32 %v343_v56, %v317_v61  ;;  %538 = vperm.xlu0 %782, %v246_v43   ;;  %v245_v56 = vld [vmem:[%s1177_s3] sm:$0xff] }
  0xb9   : > { %v361_v15 = vmul.f32 %v359_v63, %v356_v3  ;;  %v360_v39 = vmul.f32 %v358_v21, %v357_v28  ;;  %v784_v3 = vld [vmem:[#allocation2 + $0x18] ss:$0 sm:$0xff] }
  0xbb   : > { %v367_v29 = vmul.f32 %v1033_v38, %v361_v15  ;;  %v366_v57 = vmul.f32 %v1033_v38, %v360_v39 }
  0xbd   : > { %v370_v50 = vrot.slane %v367_v29, 4 }
  0xbf   : > { %v382_v48 = vpop.permute.xlu1 %381  ;;  %v1049_v49 = vpop.permute.xlu0 %407 }
  0xc0   : > { %v385_v12 = vsel %vm383_vm4, %v382_v48, %v1035_v41  ;;  %v384_v27 = vsel %vm383_vm4, %v1035_v41, %v382_v48  ;;  %v442_v41 = vperm.slane %v1054_v53, 7  ;;  %v448_v48 = vpop.permute.xlu2 %447  ;;  %v371_v53 = vsel %vm286_vm6, %v366_v57, %v370_v50 }
  0xc1   : > { %v389_v23 = vmul.f32 %v387_v6, %v385_v12  ;;  %v388_v51 = vmul.f32 %v386_v22, %v384_v27  ;;  %v373_v9 = vadd.f32 %v371_v53, %v345_v5 }
  0xc3   : > { %v395_v37 = vmul.f32 %v1042_v44, %v389_v23  ;;  %v394_v62 = vmul.f32 %v1042_v44, %v388_v51 }
  0xc7   : > { %v410_v7 = vpop.permute.xlu1 %409  ;;  %v436_v8 = vpop.permute.xlu0 %435 }
  0xc8   : > { %v413_v19 = vsel %vm411_vm5, %v410_v7, %v1049_v49  ;;  %v412_v1 = vsel %vm411_vm5, %v1049_v49, %v410_v7  ;;  %v398_v49 = vrot.slane %v395_v37, 4 }
  0xc9   : > { %v417_v31 = vmul.f32 %v415_v16, %v413_v19  ;;  %v416_v58 = vmul.f32 %v414_v40, %v412_v1 }
  0xca   : > { %v399_v6 = vsel %vm286_vm6, %v394_v62, %v398_v49 }
  0xcb   : > { %v423_v52 = vmul.f32 %v1073_v4, %v417_v31  ;;  %v422_v7 = vmul.f32 %v1073_v4, %v416_v58  ;;  %v401_v15 = vadd.f32 %v399_v6, %v373_v9 }
  0xcd   : > { %v426_v63 = vrot.slane %v423_v52, 4 }
  0xcf   : > { %v438_v45 = vpop.permute.xlu1 %437  ;;  %v464_v46 = vpop.permute.xlu0 %463  ;;  %v427_v42 = vsel %vm286_vm6, %v422_v7, %v426_v63 }
  0xd0   : > { %v441_v47 = vsel %vm439_vm7, %v438_v45, %v436_v8  ;;  %v440_v35 = vsel %vm439_vm7, %v436_v8, %v438_v45  ;;  %v429_v18 = vadd.f32 %v427_v42, %v401_v15 }
  0xd1   : > { %v445_v54 = vmul.f32 %v443_v32, %v441_v47  ;;  %v444_v0 = vmul.f32 %v442_v41, %v440_v35 }
  0xd3   : > { %v451_v60 = vmul.f32 %v448_v48, %v445_v54  ;;  %v450_v13 = vmul.f32 %v448_v48, %v444_v0 }
  0xd5   : > { %v454_v38 = vrot.slane %v451_v60, 4 }
  0xd7   : > { %v466_v8 = vpop.permute.xlu1 %465  ;;  %v476_v12 = vpop.permute.xlu0 %475  ;;  %v455_v16 = vsel %vm286_vm6, %v450_v13, %v454_v38 }
  0xd8   : > { %v468_v10 = vsel %vm467_vm8, %v464_v46, %v466_v8  ;;  %v469_v11 = vsel %vm467_vm8, %v466_v8, %v464_v46  ;;  %v457_v21 = vadd.f32 %v455_v16, %v429_v18 }
  0xd9   : > { %v472_v14 = vmul.f32 %v783_v2, %v468_v10  ;;  %v473_v44 = vmul.f32 %v784_v3, %v469_v11 }
  0xdb   : > { %v479_v17 = vmul.f32 %v476_v12, %v473_v44  ;;  %v478_v19 = vmul.f32 %v476_v12, %v472_v14 }
  0xdd   : > { %v482_v20 = vrot.slane %v479_v17, 4 }
  0xdf   : > { %v483_v4 = vsel %vm286_vm6, %v478_v19, %v482_v20 }
  0xe0   : > { %v485_v22 = vadd.f32 %v483_v4, %v457_v21 }
  0xe2   : > { %487 = vst [vmem:[#allocation1] ss:$2 sm:$0xff] %v485_v22 }
  0xe9   : > { %v488_v23 = vld.sshfl [vmem:[#allocation1] sm:$0xff pattern:$0x75316420]  ;;  %v489_v24 = vld.sshfl [vmem:[#allocation1 + $0x8] sm:$0xff pattern:$0x75316420] }
  0xea   : > { %v492_v25 = vsel %vm286_vm6, %v488_v23, 0.0  ;;  %v493_v26 = vsel %vm286_vm6, %v489_v24, 0.0 }
  0xeb   : > { %v494_v28 = vadd.f32 %v493_v26, %v492_v25 }
  0xed   : > { %495 = vadd.xlane.f32.xlu1 %v494_v28 }
 0x160   : > { %v496_v29 = vpop.xlane.xlu1 %495 }
 0x161   : > { %v497_v31 = vmul.f32 0.00390625, %v496_v29 }
 0x163   : > { %v502_v32 = vperm.slane %v497_v31, %v1061_v59 }
 0x165   : > { %v504_v33 = vsub.f32 %v485_v22, %v502_v32 }
 0x167   : > { %v505_v34 = vmul.f32 %v504_v33, %v504_v33 }
 0x169   : > { %507 = vst [vmem:[#allocation1] ss:$2 sm:$0xff] %v505_v34 }
 0x170   : > { %v508_v36 = vld.sshfl [vmem:[#allocation1] sm:$0xff pattern:$0x75316420]  ;;  %v509_v27 = vld.sshfl [vmem:[#allocation1 + $0x8] sm:$0xff pattern:$0x75316420] }
 0x171   : > { %v512_v30 = vsel %vm286_vm6, %v508_v36, 0.0  ;;  %v513_v39 = vsel %vm286_vm6, %v509_v27, 0.0 }
 0x172   : > { %v514_v37 = vadd.f32 %v513_v39, %v512_v30 }
 0x174   : > { %515 = vadd.xlane.f32.xlu2 %v514_v37 }
 0x1e7   : > { %v516_v40 = vpop.xlane.xlu2 %515 }
 0x1e8   : > { %v517_v45 = vmul.f32 0.00390625, %v516_v40 }
 0x1ea   : > { %v518_v46 = vadd.f32 1e-05, %v517_v45 }
 0x1ec   : > { %785 = vrsqrt.f32 %v518_v46  ;;  %vm525_vm10 = vweird.f32 %v518_v46 }
 0x1f2   : > { %v786_v1 = vpop.eup %785 }
 0x1f3   : > { %v520_v47 = vmul.f32 %v786_v1, %v518_v46  ;;  %vm526_vm9 = vweird.f32 %v786_v1 }
 0x1f4   : > { %vm527_vm11 = vmor %vm525_vm10, %vm526_vm9 }
 0x1f5   : > { %v521_v41 = vmul.f32 %v786_v1, %v520_v47 }
 0x1f7   : > { %v522_v48 = vmul.f32 0.5, %v521_v41 }
 0x1f9   : > { %v523_v50 = vsub.f32 1.5, %v522_v48 }
 0x1fb   : > { %v524_v51 = vmul.f32 %v786_v1, %v523_v50 }
 0x1fd   : > { %v528_v52 = vsel %vm527_vm11, %v786_v1, %v524_v51 }
 0x1fe   : > { %v533_v54 = vperm.slane %v528_v52, %v1061_v59  ;;  %v539_v59 = vpop.permute.xlu0 %538 }
 0x200   : > { %v535_v55 = vmul.f32 %v533_v54, %v504_v33 }
 0x202   : > { %542 = vst [vmem:[#allocation1] ss:$2 sm:$0xff] %v535_v55 }
 0x209   : > { %v543_v35 = vld.sshfl [vmem:[#allocation1] sm:$0xff pattern:$0x75316420]  ;;  %v544_v57 = vld.sshfl [vmem:[#allocation1 + $0x8] sm:$0xff pattern:$0x75316420] }
 0x20a   : > { %692 = vmatpush.msk.msra.mxu0 %vm286_vm6, %v543_v35  ;;  %694 = vmatpush.msk.msra.mxu1 %vm286_vm6, %v544_v57 }
 0x20b   : > { %693 = vmatmul.msk.f32.vlgmr.msra.gmra.mxu0 %vm545_vm12, %v245_v56  ;;  %695 = vmatmul.msk.f32.vlgmr.msra.gmra.mxu1 %vm545_vm12, %v245_v56 }
 0x288   : > { %v570_v49 = vpop.f32.mrf.mxu0  ;;  %v590_v58 = vpop.f32.mrf.mxu1 }
 0x289   : > { %v571_v60 = vadd.f32 %v570_v49, %v539_v59  ;;  %v591_v61 = vadd.f32 %v590_v58, %v539_v59 }
 0x28b   : > { %593 = vst [vmem:[%s234_s30] sm:$0xff] %v571_v60 }
 0x28c   : > { %594 = vst [vmem:[%s234_s30 + $0x8] sm:$0xff] %v591_v61 }
 0x28d   : > { %844 = shalt.err (!%p841_p8)
}
 0x28e   : > { %707 = dma.vmem_to_hbm [thread:$0]  (%p974_p5), %s610_s6, 256, %s612_s7, %s596_s8  }
 0x28f PF: > { %p719_p9 = scmp.ge.s32.totalorder %s883_s21, 2  ;;  %s623_s15 = sand.u32 1, %s871_s18  }
 0x290   : > { %s624_s16 = scalar_lea.sflag [#allocation4], %s623_s15 }
 0x291   : > { %p714_p10 = pnand %p719_p9, %p978_p6 }
 0x293   : > { %p715_p11 = pneg %p714_p10 }
 0x295   : > { %866 = dma.done.wait (%p715_p11), %s624_s16, 256  }
 0x296   : > { %868 = vsyncadd (%p715_p11), %s624_s16, 4294967040  ;;  %p16_p12 = scmp.ge.s32.totalorder %s961_s24, 4   ;;  %s1182_s18 = smov %s875_s19 }
 0x297   : > { %s1183_s19 = smov %s879_s20  ;;  %s1184_s20 = smov %s972_s27 }
 0x298   : > { %s1185_s21 = smov %s961_s24  ;;  %18 = sbr.rel (!%p16_p12) target bundleno = 4 (0x4), region = 80 }
 0x29d   :  { %630 = vsyncpa [#allocation3], 1 }
 0x29e   :  { %632 = vsyncpa [#allocation3 + $0x1], 1 }
 0x29f   :  { %633 = vsyncpa [#allocation4], 1 }
 0x2a0   :  { %635 = vsyncpa [#allocation4 + $0x1], 1 }

</bundles_post_ra>
